<compile_context>
chip_gen: v7x
topology: tpu7x:2x2x1
jax: 0.10.0
libtpu: 0.0.40
codegen_flags: <defaults>
</compile_context>

<pallas_src>
import jax
import jax.numpy as jnp
from jax.experimental import pallas as pl
from jax.experimental.pallas import tpu as pltpu


def _vmem_capacity_bytes():
    """Generation-aware VMEM capacity, with a v7x-safe (64 MiB) fallback."""
    try:
        info = pltpu.get_tpu_info()
        cap = getattr(info, "vmem_capacity_bytes", None)
        if cap:
            return int(cap)
    except Exception:
        pass
    return 64 << 20


def _sublane_multiple(dtype):
    itemsize = jnp.dtype(dtype).itemsize
    return {4: 8, 2: 16, 1: 32}.get(itemsize, 8)


def _focal_loss_kernel(*, gamma, true_b, tb, need_row_mask):
    gamma_f = float(gamma)
    gamma_is_small_int = gamma_f.is_integer() and 0.0 <= gamma_f <= 8.0

    def kernel(logits_ref, tgt_ref, at_ref, out_ref):
        i = pl.program_id(0)

        # Upcast in-kernel: HBM traffic stays at the input dtype width (bf16 ok);
        # all arithmetic is f32 (v5e has no bf16 VPU/EUP).
        logits = logits_ref[...].astype(jnp.float32)        # (TB, C)
        tgt = tgt_ref[...]                                   # (TB, 1) int32
        at = at_ref[...]                                      # (TB, 1) f32

        TB, C = logits.shape

        # log-softmax pieces along the class (lane) axis; `shifted` is never
        # materialized as a full (TB, C) buffer.
        m = jnp.max(logits, axis=1, keepdims=True)                         # XLU reduce 1
        sumexp = jnp.sum(jnp.exp(logits - m), axis=1, keepdims=True)       # EUP + XLU reduce 2
        lse = jnp.log(sumexp)

        # One-hot gather of the target logit, folded into a single masked reduce.
        col = jax.lax.broadcasted_iota(jnp.int32, (TB, C), 1)
        logit_t = jnp.sum(jnp.where(col == tgt, logits, 0.0),
                          axis=1, keepdims=True)                           # XLU reduce 3

        log_pt = (logit_t - m) - lse                                       # (TB, 1)
        pt = jnp.exp(log_pt)          # narrow (TB,1) exp; pt uses pre-alpha log_pt

        one_minus_pt = jnp.maximum(1.0 - pt, 0.0)   # clamp keeps pow NaN-free
        if gamma_is_small_int:
            focal = jnp.ones_like(one_minus_pt)
            for _ in range(int(gamma_f)):            # unrolled VPU muls, no EUP pow
                focal = focal * one_minus_pt
        else:
            focal = one_minus_pt ** gamma_f          # non-integer gamma: EUP log+exp

        loss = -focal * (log_pt * at)                # (TB, 1)

        if need_row_mask:
            # Partial last tile: rows >= true_b contain garbage -> select them to 0.
            row = jax.lax.broadcasted_iota(jnp.int32, (TB, 1), 0) + i * tb
            loss = jnp.where(row < true_b, loss, 0.0)

        # One partial sum per grid step; the tiny final reduction is done in XLA.
        out_ref[0] = jnp.sum(loss, axis=0, keepdims=True)

    return kernel


def focal_loss(logits, targets, alpha=None, gamma=2.0, reduction="mean",
               max_tb=None):
    """logits: (B, C) float (f32 or bf16); targets: (B,) int; alpha: (C,) or None.

    Returns a scalar f32 (reduction='mean' or 'sum').
    """
    assert reduction in ("mean", "sum")
    # TODO(synk): reduction='none' (per-sample vector output) and ignore_index are
    # not implemented; the reference forward() never uses ignore_index.
    B, C = logits.shape
    in_dtype = logits.dtype
    itemsize = jnp.dtype(in_dtype).itemsize
    sublane = _sublane_multiple(in_dtype)

    # Per-class weight gathered per-row on the host side of the kernel (O(B) gather).
    if alpha is None:
        at = jnp.ones((B, 1), jnp.float32)
    else:
        at = alpha.astype(jnp.float32)[targets].reshape(B, 1)
    tgt2d = targets.astype(jnp.int32).reshape(B, 1)

    # --- tile sizing -------------------------------------------------------
    vmem_cap = _vmem_capacity_bytes()
    vmem_budget = (vmem_cap * 7) // 10        # ~45 MiB on v7x, ~89 MiB on v5e/v6e
    target_tile_bytes = 8 << 20               # aim for a multi-MiB logits tile

    row_bytes_in = max(C * itemsize, 1)
    # Double-buffered native-dtype input + conservative count of f32 tile-width temps.
    row_bytes_work = max((2 * itemsize + 6 * 4) * C, 1)

    tb = min(target_tile_bytes // row_bytes_in, vmem_budget // row_bytes_work)
    tb = max(int(tb), 1)
    if max_tb is not None:
        tb = min(tb, int(max_tb))
    if tb < B:
        tb = max(sublane, (tb // sublane) * sublane)
    if tb >= B:
        tb = B            # a single full-extent block is always layout-legal

    grid_g = pl.cdiv(B, tb)
    need_row_mask = grid_g * tb != B

    vmem_limit = int(max(32 << 20, vmem_cap - (8 << 20)))

    kernel = _focal_loss_kernel(gamma=gamma, true_b=B, tb=tb,
                                need_row_mask=need_row_mask)

    partials = pl.pallas_call(
        kernel,
        out_shape=jax.ShapeDtypeStruct((grid_g, 1, 1), jnp.float32),
        grid_spec=pltpu.PrefetchScalarGridSpec(
            num_scalar_prefetch=0,
            grid=(grid_g,),
            in_specs=[
                pl.BlockSpec((tb, C), lambda i: (i, 0)),   # logits tile (native dtype)
                pl.BlockSpec((tb, 1), lambda i: (i, 0)),   # targets tile
                pl.BlockSpec((tb, 1), lambda i: (i, 0)),   # alpha[targets] tile
            ],
            out_specs=pl.BlockSpec((1, 1, 1), lambda i: (i, 0, 0)),
        ),
        compiler_params=pltpu.CompilerParams(
            dimension_semantics=("parallel",),   # independent partial sums -> megacore-OK
            vmem_limit_bytes=vmem_limit,
        ),
    )(logits, tgt2d, at)

    total = jnp.sum(partials)
    if reduction == "mean":
        return total / jnp.float32(B)
    return total


def focal_loss_ref(logits, targets, alpha, gamma=2.0):
    log_probs = jax.nn.log_softmax(logits.astype(jnp.float32), axis=1)
    probs = jnp.exp(log_probs)
    B = logits.shape[0]
    log_pt = log_probs[jnp.arange(B), targets]
    pt = probs[jnp.arange(B), targets]
    if alpha is not None:
        at = alpha.astype(jnp.float32)[targets]
        log_pt = log_pt * at
    loss = -((1.0 - pt) ** gamma) * log_pt
    return jnp.mean(loss)


if __name__ == "__main__":
    key = jax.random.PRNGKey(0)
    gamma = 2.0

    # --- test 1: small f32, single block (B=8, C=32, C not a multiple of 128) ---
    B, C = 8, 32
    k1, k2, k3, k4 = jax.random.split(key, 4)
    logits = jax.random.normal(k1, (B, C), dtype=jnp.float32)
    targets = jax.random.randint(k2, (B,), 0, C, dtype=jnp.int32)
    alpha = 0.5 + 0.5 * (jnp.arange(C, dtype=jnp.float32) / C)

    out = focal_loss(logits, targets, alpha, gamma=gamma)
    jax.block_until_ready(out)
    ref = focal_loss_ref(logits, targets, alpha, gamma=gamma)
    assert jnp.allclose(out, ref, atol=1e-5, rtol=1e-5), (out, ref)

    # --- test 2: batch not a multiple of the sublane -> full-dim block, true-B mean ---
    B2, C2 = 13, 40
    logits2 = jax.random.normal(k3, (B2, C2), dtype=jnp.float32)
    targets2 = jax.random.randint(k4, (B2,), 0, C2, dtype=jnp.int32)
    alpha2 = 0.25 + 0.75 * (jnp.arange(C2, dtype=jnp.float32) / C2)
    out2 = focal_loss(logits2, targets2, alpha2, gamma=gamma)
    jax.block_until_ready(out2)
    ref2 = focal_loss_ref(logits2, targets2, alpha2, gamma=gamma)
    assert jnp.allclose(out2, ref2, atol=1e-5, rtol=1e-5), (out2, ref2)

    # --- test 3: multi-step grid with a partial last tile (B=40, forced TB=16) ---
    B3, C3 = 40, 32
    k5, k6 = jax.random.split(k3)
    logits3 = jax.random.normal(k5, (B3, C3), dtype=jnp.float32)
    targets3 = jax.random.randint(k6, (B3,), 0, C3, dtype=jnp.int32)
    out3 = focal_loss(logits3, targets3, alpha, gamma=gamma, max_tb=16)
    jax.block_until_ready(out3)
    ref3 = focal_loss_ref(logits3, targets3, alpha, gamma=gamma)
    assert jnp.allclose(out3, ref3, atol=1e-5, rtol=1e-5), (out3, ref3)

    # --- test 4: bf16 inputs pass through at native width, upcast in-kernel ---
    logits_bf16 = logits.astype(jnp.bfloat16)
    out4 = focal_loss(logits_bf16, targets, alpha, gamma=gamma)
    jax.block_until_ready(out4)
    ref4 = focal_loss_ref(logits_bf16, targets, alpha, gamma=gamma)
    assert jnp.allclose(out4, ref4, atol=1e-3, rtol=1e-3), (out4, ref4)

    # --- test 5: reduction='sum' and alpha=None path ---
    out5 = focal_loss(logits, targets, None, gamma=gamma, reduction="sum")
    jax.block_until_ready(out5)
    ref5 = focal_loss_ref(logits, targets, None, gamma=gamma) * B
    assert jnp.allclose(out5, ref5, atol=1e-5, rtol=1e-5), (out5, ref5)

    print("KERNEL_OK")
</pallas_src>

<mosaic_0001>
module attributes {stable_mosaic.version = 11 : i64} {
  func.func @kernel(%arg0: i32, %arg1: memref<8x32xf32, #tpu.memory_space<vmem>>, %arg2: memref<8x1xi32, #tpu.memory_space<vmem>>, %arg3: memref<8x1xf32, #tpu.memory_space<vmem>>, %arg4: memref<1x1x1xf32, #tpu.memory_space<vmem>>) attributes {dimension_semantics = [#tpu.dimension_semantics<parallel>], iteration_bounds = array<i64: 1>, scalar_prefetch = 0 : i64, scratch_operands = 0 : i64, tpu.core_type = #tpu.core_type<tc>, window_params = [{transform_indices = @transform_0, window_bounds = array<i64: 8, 32>}, {transform_indices = @transform_1, window_bounds = array<i64: 8, 1>}, {transform_indices = @transform_2, window_bounds = array<i64: 8, 1>}, {transform_indices = @transform_3, window_bounds = array<i64: 1, 1, 1>}]} {
    %c0 = arith.constant 0 : index
    %c0_0 = arith.constant 0 : index
    %0 = vector.load %arg1[%c0, %c0_0] : memref<8x32xf32, #tpu.memory_space<vmem>>, vector<8x32xf32>
    %c0_1 = arith.constant 0 : index
    %c0_2 = arith.constant 0 : index
    %1 = vector.load %arg2[%c0_1, %c0_2] : memref<8x1xi32, #tpu.memory_space<vmem>>, vector<8x1xi32>
    %c0_3 = arith.constant 0 : index
    %c0_4 = arith.constant 0 : index
    %2 = vector.load %arg3[%c0_3, %c0_4] : memref<8x1xf32, #tpu.memory_space<vmem>>, vector<8x1xf32>
    %cst = arith.constant dense<0xFF800000> : vector<8xf32>
    %3 = vector.multi_reduction <maximumf>, %0, %cst [1] : vector<8x32xf32> to vector<8xf32>
    %4 = vector.shape_cast %3 : vector<8xf32> to vector<8x1xf32>
    %5 = vector.broadcast %4 : vector<8x1xf32> to vector<8x32xf32>
    %6 = arith.subf %0, %5 : vector<8x32xf32>
    %7 = math.exp %6 : vector<8x32xf32>
    %cst_5 = arith.constant dense<0.000000e+00> : vector<8xf32>
    %8 = vector.multi_reduction <add>, %7, %cst_5 [1] : vector<8x32xf32> to vector<8xf32>
    %9 = vector.shape_cast %8 : vector<8xf32> to vector<8x1xf32>
    %10 = math.log %9 : vector<8x1xf32>
    %11 = tpu.iota {dimensions = array<i32: 1>} : vector<8x32xi32>
    %12 = vector.broadcast %1 : vector<8x1xi32> to vector<8x32xi32>
    %13 = arith.cmpi eq, %11, %12 : vector<8x32xi32>
    %cst_6 = arith.constant 0.000000e+00 : f32
    %14 = vector.broadcast %cst_6 : f32 to vector<8x32xf32>
    %15 = arith.select %13, %0, %14 : vector<8x32xi1>, vector<8x32xf32>
    %cst_7 = arith.constant dense<0.000000e+00> : vector<8xf32>
    %16 = vector.multi_reduction <add>, %15, %cst_7 [1] : vector<8x32xf32> to vector<8xf32>
    %17 = vector.shape_cast %16 : vector<8xf32> to vector<8x1xf32>
    %18 = arith.subf %17, %4 : vector<8x1xf32>
    %19 = arith.subf %18, %10 : vector<8x1xf32>
    %20 = math.exp %19 : vector<8x1xf32>
    %cst_8 = arith.constant 1.000000e+00 : f32
    %21 = vector.broadcast %cst_8 : f32 to vector<8x1xf32>
    %22 = arith.subf %21, %20 : vector<8x1xf32>
    %cst_9 = arith.constant 0.000000e+00 : f32
    %23 = vector.broadcast %cst_9 : f32 to vector<8x1xf32>
    %24 = arith.maximumf %22, %23 : vector<8x1xf32>
    %cst_10 = arith.constant 1.000000e+00 : f32
    %25 = vector.broadcast %cst_10 : f32 to vector<8x1xf32>
    %26 = arith.mulf %25, %24 : vector<8x1xf32>
    %27 = arith.mulf %26, %24 : vector<8x1xf32>
    %cst_11 = arith.constant 0.000000e+00 : f32
    %28 = vector.broadcast %cst_11 : f32 to vector<8x1xf32>
    %29 = arith.subf %28, %27 : vector<8x1xf32>
    %30 = arith.mulf %19, %2 : vector<8x1xf32>
    %31 = arith.mulf %29, %30 : vector<8x1xf32>
    %cst_12 = arith.constant dense<0.000000e+00> : vector<1xf32>
    %32 = vector.multi_reduction <add>, %31, %cst_12 [0] : vector<8x1xf32> to vector<1xf32>
    %33 = vector.shape_cast %32 : vector<1xf32> to vector<1x1xf32>
    %c0_13 = arith.constant 0 : index
    %c0_14 = arith.constant 0 : index
    %c0_15 = arith.constant 0 : index
    %34 = vector.load %arg4[%c0_13, %c0_14, %c0_15] : memref<1x1x1xf32, #tpu.memory_space<vmem>>, vector<1x1x1xf32>
    %35 = vector.shape_cast %34 : vector<1x1x1xf32> to vector<1x1xf32>
    %36 = vector.shape_cast %33 : vector<1x1xf32> to vector<1x1x1xf32>
    tpu.vector_store %arg4[%c0_13, %c0_14, %c0_15], %36 {strides = array<i32>} : memref<1x1x1xf32, #tpu.memory_space<vmem>>, vector<1x1x1xf32>,
    return
  }
  func.func @transform_0(%arg0: i32) -> (i32, i32) {
    %c0_i32 = arith.constant 0 : i32
    %c0_i32_0 = arith.constant 0 : i32
    return %arg0, %c0_i32 : i32, i32
  }
  func.func @transform_1(%arg0: i32) -> (i32, i32) {
    %c0_i32 = arith.constant 0 : i32
    %c0_i32_0 = arith.constant 0 : i32
    return %arg0, %c0_i32 : i32, i32
  }
  func.func @transform_2(%arg0: i32) -> (i32, i32) {
    %c0_i32 = arith.constant 0 : i32
    %c0_i32_0 = arith.constant 0 : i32
    return %arg0, %c0_i32 : i32, i32
  }
  func.func @transform_3(%arg0: i32) -> (i32, i32, i32) {
    %c0_i32 = arith.constant 0 : i32
    %c0_i32_0 = arith.constant 0 : i32
    %c0_i32_1 = arith.constant 0 : i32
    return %arg0, %c0_i32, %c0_i32_0 : i32, i32, i32
  }
}

</mosaic_0001>

<bundles_post_ra>
// kernel: tpu_custom_call.1
= control target key start
LH: loop header
LB: loop body
LE: loop exit
PB: predicated region body
PF: predicated region fallthrough
CT: control target
= control target key end

     0   :  { %vm18_vm0 = vcmask 261120   ;;  %s153_s0 = inlined_call_operand.vmem [shape: f32[8,32], index: 0, kind: input, shape index: {}]   ;;  %s154_s1 = inlined_call_operand.vmem [shape: s32[8,1], index: 1, kind: input, shape index: {}]   ;;  %s155_s2 = inlined_call_operand.vmem [shape: f32[8,1], index: 2, kind: input, shape index: {}]   ;;  %s156_s3 = inlined_call_operand.hbm [shape: f32[1,1,1], index: 3, kind: output, shape index: {}]  }
   0x1   :  { %v15_v0 = vld [vmem:[%s153_s0] sm:$0xff] }
   0x2   :  { %8 = vsyncpa [#allocation3], 0  ;;  %v19_v1 = vsel %vm18_vm0, %v15_v0, -inf  ;;  %v107_v2 = vmov 0   ;;  %v16_v3 = vld [vmem:[%s154_s1] sm:$0xff]  ;;  %v30_v7 = vlaneseq  ;;  %vm50_vm2 = vcmask 7168  }
   0x3   :  { %76 = vset.pattern.permute.xlu0 %v107_v2  ;;  %v17_v24 = vld [vmem:[%s155_s2] sm:$0xff]  ;;  %s108_s16 = smov [#allocation2]   ;;  %vm58_vm3 = vcmask 0  }
   0x4   :  { %20 = vmax.xlane.f32.xlu0 %v19_v1  ;;  %v31_v8 = vand.u32 127, %v30_v7  ;;  %s66_s17 = sshll.u32 %s108_s16, 4  ;;  %s67_s17 = int_to_ptr.vmem [resolvable:$true] %s66_s17 }
   0x5   :  { %s83_s18 = scalar_lea.vmem %s67_s17, 16  ;;  %s87_s2 = scalar_lea.vmem %s67_s17, 32 }
   0x6   :  { %p84_p0 = scmp.ne.s32.totalorder %s67_s17, %s83_s18  ;;  %p88_p1 = scmp.lt.s32.totalorder %s67_s17, %s67_s17 }
   0x7   :  { %p89_p2 = scmp.lt.s32.totalorder %s87_s2, %s83_s18 }
   0x9   :  { %p90_p3 = por %p89_p2, %p88_p1 }
   0xb   :  { %p91_p4 = pnand %p90_p3, %p84_p0 }
  0x1a   :  { %33 = vperm.xlu0 %76, %v16_v3  }
  0x91   :  { %v21_v4 = vpop.xlane.xlu0 %20 }
  0x92   :  { %v22_v5 = vsub.f32 %v15_v0, %v21_v4 }
  0x94   :  { %v23_v6 = vmul.f32 1.442695, %v22_v5 }
  0x96   :  { %77 = vpow2.f32 %v23_v6 }
  0x99   :  { %v34_v9 = vpop.permute.xlu0 %33 }
  0x9a   :  { %vm35_vm1 = vcmp.eq.s32.totalorder %v31_v8, %v34_v9 }
  0x9b   :  { %v36_v11 = vsel %vm35_vm1, %v15_v0, 0.0 }
  0x9c   :  { %v37_v13 = vsel %vm18_vm0, %v36_v11, 0.0 }
  0xa0   :  { %v78_v10 = vpop.eup %77 }
  0xa1   :  { %v25_v12 = vsel %vm18_vm0, %v78_v10, 0.0 }
  0xa2   :  { %26 = vadd.xlane.f32.xlu1 %v25_v12 }
  0xa6   :  { %38 = vadd.xlane.f32.xlu1 %v37_v13 }
 0x12f   :  { %v27_v14 = vpop.xlane.xlu1 %26 }
 0x130   :  { %79 = vlog2.f32 %v27_v14 }
 0x133   :  { %v39_v15 = vpop.xlane.xlu1 %38 }
 0x134   :  { %v40_v18 = vsub.f32 %v39_v15, %v21_v4 }
 0x13a   :  { %v80_v16 = vpop.eup %79 }
 0x13b   :  { %v29_v17 = vmul.f32 0.6931472, %v80_v16 }
 0x13d   :  { %v41_v19 = vsub.f32 %v40_v18, %v29_v17 }
 0x13f   :  { %v42_v20 = vmul.f32 1.442695, %v41_v19  ;;  %v48_v27 = vmul.f32 %v41_v19, %v17_v24 }
 0x141   :  { %81 = vpow2.f32 %v42_v20 }
 0x14b   :  { %v82_v21 = vpop.eup %81 }
 0x14c   :  { %v44_v22 = vsub.f32 1.0, %v82_v21 }
 0x14e   :  { %v45_v23 = vmax.f32 %v44_v22, 0.0 }
 0x150   :  { %v46_v25 = vmul.f32 %v45_v23, %v45_v23 }
 0x152   :  { %v47_v26 = vsub.f32 0.0, %v46_v25 }
 0x154   :  { %v49_v28 = vmul.f32 %v48_v27, %v47_v26 }
 0x156   :  { %v51_v29 = vsel %vm50_vm2, %v49_v28, 0.0 }
 0x157   :  { %v52_v30 = vrot.slane %v51_v29, 4 }
 0x159   :  { %v53_v31 = vadd.f32 %v52_v30, %v51_v29 }
 0x15b   :  { %v54_v32 = vrot.slane %v53_v31, 2 }
 0x15d   :  { %v55_v33 = vadd.f32 %v54_v32, %v53_v31 }
 0x15f   :  { %v56_v34 = vrot.slane %v55_v33, 1 }
 0x161   :  { %v57_v35 = vadd.f32 %v56_v34, %v55_v33 }
 0x163   :  { %59 = vst.msk [vmem:[#allocation2] sm:$0x1] %vm58_vm3, %v57_v35 }
 0x164   :  { %94 = shalt.err (!%p91_p4)
}
 0x165   :  { %s95_s21 = scalar_lea.hbm %s156_s3, 16 }
 0x166   :  { %p96_p5 = scmp.ne.s32.totalorder %s156_s3, %s95_s21  ;;  %p99_p6 = scmp.lt.u32.totalorder %s95_s21, %s156_s3 }
 0x168   :  { %p101_p7 = pnand %p99_p6, %p96_p5 }
 0x16a   :  { %104 = shalt.err (!%p101_p7)
}
 0x16b   :  { %69 = dma.vmem_to_hbm [thread:$0]  %s67_s17, 16, %s156_s3, [#allocation3]  }
 0x16c   :  { %105 = dma.done.wait [#allocation3], 16  }
 0x16d   :  { %106 = vsyncadd [#allocation3], 4294967280 }
 0x16e   :  { %73 = vsyncpa [#allocation3], 1 }

</bundles_post_ra>
